<compile_context>
chip_gen: v7x
topology: tpu7x:2x2x1
jax: 0.10.0
libtpu: 0.0.40
codegen_flags: <defaults>
</compile_context>

<pallas_src>
import functools

import jax
import jax.numpy as jnp
import numpy as np
from jax.experimental import pallas as pl
from jax.experimental.pallas import tpu as pltpu


# ----------------------------- fused Pallas kernel -----------------------------

def fused_gin_kernel(eps_ref, adj_ref, pool_ref, x_ref, w_ref, b_ref, out_ref,
                     *, num_layers):
    """All GIN layers + global_add_pool in one kernel.

    eps_ref : SMEM (L,)            f32   per-layer learnable eps
    adj_ref : VMEM (Np, Np)        bf16  0/1 adjacency, adj[dst, src]
    pool_ref: VMEM (Gp, Np)        bf16  0/1 one-hot pooling matrix
    x_ref   : VMEM (Np, Dp)        f32   padded node features
    w_ref   : VMEM (L, Dp, Dp)     f32   stacked (already-transposed) weights
    b_ref   : VMEM (L, 1, Dp)      f32   stacked biases
    out_ref : VMEM (Gp, Dp)        f32   pooled graph embeddings (padded)
    """
    # 0/1 values are exact in bf16, so this cast is lossless; hoisted out of the
    # layer loop (JAX does not CSE broadcasts/casts inside unrolled loops).
    adj = adj_ref[...].astype(jnp.float32)

    h = x_ref[...]
    for li in range(num_layers):
        # Neighbor aggregation (sum over sources) on the MXU.
        agg = jnp.dot(adj, h, preferred_element_type=jnp.float32)
        # (1 + eps) comes from an SMEM scalar (scalar unit, no VMEM tile).
        z = (1.0 + eps_ref[li]) * h + agg
        # Linear: z @ W^T + b, bias-add + ReLU fused into the same VPU pass.
        h = jnp.dot(z, w_ref[li], preferred_element_type=jnp.float32) + b_ref[li]
        if li < num_layers - 1:
            h = jnp.maximum(h, 0.0)
        # (With uniformly 128-padded feature dims, swapping the matmul order per
        #  layer -- running adj@(xW) when d_out < d_in -- gives no extra benefit.)

    # global_add_pool: one-hot (Gp, Np) @ (Np, Dp) -> single unmasked (8,128) store.
    pool = pool_ref[...].astype(jnp.float32)
    out_ref[...] = jnp.dot(pool, h, preferred_element_type=jnp.float32).astype(
        out_ref.dtype)


# ------------------------------ wrapper -----------------------------------

def gin_model_forward(x_pad, adj_bf16, pool_bf16, eps_all, w_all, b_all,
                      num_graphs, out_dim):
    """Run the fused GIN forward. Returns the unpadded (num_graphs, out_dim) output."""
    n_layers = w_all.shape[0]
    g_pad = pool_bf16.shape[0]
    d_pad = x_pad.shape[1]

    kernel = functools.partial(fused_gin_kernel, num_layers=n_layers)
    vmem = pltpu.MemorySpace.VMEM
    out_padded = pl.pallas_call(
        kernel,
        out_shape=jax.ShapeDtypeStruct((g_pad, d_pad), jnp.float32),
        in_specs=[
            pl.BlockSpec(memory_space=pltpu.MemorySpace.SMEM),  # eps scalars
            pl.BlockSpec(memory_space=vmem),                    # adj (bf16)
            pl.BlockSpec(memory_space=vmem),                    # pool (bf16)
            pl.BlockSpec(memory_space=vmem),                    # x
            pl.BlockSpec(memory_space=vmem),                    # stacked W
            pl.BlockSpec(memory_space=vmem),                    # stacked b
        ],
        out_specs=pl.BlockSpec(memory_space=vmem),
    )(eps_all, adj_bf16, pool_bf16, x_pad, w_all, b_all)

    return out_padded[:num_graphs, :out_dim]


# --------------------------- reference (pure JAX) ---------------------------

def gin_model_reference(x, adj, pool_mat, params):
    n_layers = len(params)
    for li, (w_t, b, eps) in enumerate(params):
        h = (1.0 + eps) * x + adj @ x
        x = h @ w_t + b
        if li < n_layers - 1:
            x = jnp.maximum(x, 0.0)
    return pool_mat @ x


# ------------------------------- main ---------------------------------------

if __name__ == "__main__":
    key = jax.random.PRNGKey(0)

    # Small, deterministic problem:
    num_graphs = 2
    nodes_per_graph = 8
    N = num_graphs * nodes_per_graph            # 16 nodes total
    in_dim, hidden_dim, out_dim, num_layers = 8, 32, 8, 3

    # Padded (lane/sublane-dense) sizes.
    D_PAD = 128                                  # feature dims -> 128 lanes
    N_PAD = 128                                  # node axis -> 128 (adj/pool lane dim)
    G_PAD = 8                                    # graph axis -> 8 sublanes

    # --- node features ---
    key, k_x = jax.random.split(key)
    x = jax.random.normal(k_x, (N, in_dim), dtype=jnp.float32)

    # --- edge_index: bidirectional ring within each graph -> dense adjacency ---
    src_list, dst_list = [], []
    for g in range(num_graphs):
        base = g * nodes_per_graph
        for i in range(nodes_per_graph):
            j = (i + 1) % nodes_per_graph
            src_list += [base + i, base + j]
            dst_list += [base + j, base + i]
    src = np.array(src_list, dtype=np.int32)
    dst = np.array(dst_list, dtype=np.int32)
    adj_np = np.zeros((N, N), dtype=np.float32)
    adj_np[dst, src] = 1.0                       # adj[dst, src]: sum messages src->dst

    # --- batch vector -> one-hot pooling matrix (num_graphs, N) ---
    batch = np.repeat(np.arange(num_graphs), nodes_per_graph)
    pool_np = np.zeros((num_graphs, N), dtype=np.float32)
    pool_np[batch, np.arange(N)] = 1.0

    # --- zero-padded, lane-dense versions for the kernel ---
    x_pad_np = np.zeros((N_PAD, D_PAD), dtype=np.float32)
    x_pad_np[:N, :in_dim] = np.asarray(x)
    adj_pad_np = np.zeros((N_PAD, N_PAD), dtype=np.float32)
    adj_pad_np[:N, :N] = adj_np
    pool_pad_np = np.zeros((G_PAD, N_PAD), dtype=np.float32)
    pool_pad_np[:num_graphs, :N] = pool_np

    # --- deterministic parameter init (PyTorch Linear default U(-1/sqrt(fan_in), +)),
    #     eps per layer (train_eps=True -> learnable; nonzero values exercise it) ---
    dim_list = [in_dim] + [hidden_dim] * (num_layers - 1) + [out_dim]
    w_all_np = np.zeros((num_layers, D_PAD, D_PAD), dtype=np.float32)
    b_all_np = np.zeros((num_layers, 1, D_PAD), dtype=np.float32)
    eps_all_np = np.zeros((num_layers,), dtype=np.float32)
    params_ref = []
    for li, (d_in, d_out) in enumerate(zip(dim_list[:-1], dim_list[1:])):
        key, kw, kb, ke = jax.random.split(key, 4)
        bound = 1.0 / np.sqrt(d_in)
        w_pt = jax.random.uniform(kw, (d_out, d_in), jnp.float32, -bound, bound)
        b_pt = jax.random.uniform(kb, (d_out,), jnp.float32, -bound, bound)
        eps = jax.random.uniform(ke, (), jnp.float32, -0.1, 0.1)
        w_t = jnp.transpose(w_pt)                # (d_in, d_out), kernel does h @ w_t
        w_all_np[li, :d_in, :d_out] = np.asarray(w_t)
        b_all_np[li, 0, :d_out] = np.asarray(b_pt)
        eps_all_np[li] = float(eps)
        params_ref.append((w_t, b_pt.reshape(1, d_out), eps))

    # --- device arrays (adj / pool stored as bf16: exact for 0/1 values) ---
    x_pad = jnp.asarray(x_pad_np)
    adj_bf16 = jnp.asarray(adj_pad_np, dtype=jnp.bfloat16)
    pool_bf16 = jnp.asarray(pool_pad_np, dtype=jnp.bfloat16)
    w_all = jnp.asarray(w_all_np)
    b_all = jnp.asarray(b_all_np)
    eps_all = jnp.asarray(eps_all_np)

    # --- run fused Pallas kernel ---
    out = gin_model_forward(x_pad, adj_bf16, pool_bf16, eps_all, w_all, b_all,
                            num_graphs, out_dim)
    out = jax.block_until_ready(out)

    # --- sanity check against pure-JAX reference (unpadded, f32) ---
    ref = jax.block_until_ready(
        gin_model_reference(x, jnp.asarray(adj_np), jnp.asarray(pool_np), params_ref))
    assert out.shape == (num_graphs, out_dim)
    np.testing.assert_allclose(np.asarray(out), np.asarray(ref), rtol=1e-2, atol=1e-2)

    print("KERNEL_OK")
</pallas_src>

<mosaic_0001>
module attributes {stable_mosaic.version = 11 : i64} {
  func.func @fused_gin_kernel(%arg0: memref<3xf32, #tpu.memory_space<smem>>, %arg1: memref<128x128xbf16, #tpu.memory_space<vmem>>, %arg2: memref<8x128xbf16, #tpu.memory_space<vmem>>, %arg3: memref<128x128xf32, #tpu.memory_space<vmem>>, %arg4: memref<3x128x128xf32, #tpu.memory_space<vmem>>, %arg5: memref<3x1x128xf32, #tpu.memory_space<vmem>>, %arg6: memref<8x128xf32, #tpu.memory_space<vmem>>) attributes {dimension_semantics = [], scalar_prefetch = 0 : i64, scratch_operands = 0 : i64, tpu.core_type = #tpu.core_type<tc>} {
    %c0 = arith.constant 0 : index
    %c0_0 = arith.constant 0 : index
    %0 = vector.load %arg1[%c0, %c0_0] : memref<128x128xbf16, #tpu.memory_space<vmem>>, vector<128x128xbf16>
    %1 = arith.extf %0 : vector<128x128xbf16> to vector<128x128xf32>
    %c0_1 = arith.constant 0 : index
    %c0_2 = arith.constant 0 : index
    %2 = vector.load %arg3[%c0_1, %c0_2] : memref<128x128xf32, #tpu.memory_space<vmem>>, vector<128x128xf32>
    %cst = arith.constant dense<0.000000e+00> : vector<128x128xf32>
    %3 = tpu.matmul %1, %2, %cst {dimension_numbers = #tpu.dot_dimension_numbers<[1], [0], [0], [1], [0, 0, 1, 1], [], []>} : vector<128x128xf32>, vector<128x128xf32>, vector<128x128xf32> -> vector<128x128xf32>
    %c0_3 = arith.constant 0 : index
    %4 = memref.load %arg0[%c0_3] : memref<3xf32, #tpu.memory_space<smem>>
    %cst_4 = arith.constant 1.000000e+00 : f32
    %5 = arith.addf %cst_4, %4 : f32
    %6 = vector.broadcast %5 : f32 to vector<128x128xf32>
    %7 = arith.mulf %6, %2 : vector<128x128xf32>
    %8 = arith.addf %7, %3 : vector<128x128xf32>
    %c0_5 = arith.constant 0 : index
    %c0_6 = arith.constant 0 : index
    %c0_7 = arith.constant 0 : index
    %9 = vector.load %arg4[%c0_5, %c0_6, %c0_7] : memref<3x128x128xf32, #tpu.memory_space<vmem>>, vector<1x128x128xf32>
    %10 = vector.shape_cast %9 : vector<1x128x128xf32> to vector<128x128xf32>
    %cst_8 = arith.constant dense<0.000000e+00> : vector<128x128xf32>
    %11 = tpu.matmul %8, %10, %cst_8 {dimension_numbers = #tpu.dot_dimension_numbers<[1], [0], [0], [1], [0, 0, 1, 1], [], []>} : vector<128x128xf32>, vector<128x128xf32>, vector<128x128xf32> -> vector<128x128xf32>
    %c0_9 = arith.constant 0 : index
    %c0_10 = arith.constant 0 : index
    %c0_11 = arith.constant 0 : index
    %12 = vector.load %arg5[%c0_9, %c0_10, %c0_11] : memref<3x1x128xf32, #tpu.memory_space<vmem>>, vector<1x1x128xf32>
    %13 = vector.shape_cast %12 : vector<1x1x128xf32> to vector<1x128xf32>
    %14 = vector.broadcast %13 : vector<1x128xf32> to vector<128x128xf32>
    %15 = arith.addf %11, %14 : vector<128x128xf32>
    %cst_12 = arith.constant 0.000000e+00 : f32
    %16 = vector.broadcast %cst_12 : f32 to vector<128x128xf32>
    %17 = arith.maximumf %15, %16 : vector<128x128xf32>
    %cst_13 = arith.constant dense<0.000000e+00> : vector<128x128xf32>
    %18 = tpu.matmul %1, %17, %cst_13 {dimension_numbers = #tpu.dot_dimension_numbers<[1], [0], [0], [1], [0, 0, 1, 1], [], []>} : vector<128x128xf32>, vector<128x128xf32>, vector<128x128xf32> -> vector<128x128xf32>
    %c1 = arith.constant 1 : index
    %19 = memref.load %arg0[%c1] : memref<3xf32, #tpu.memory_space<smem>>
    %cst_14 = arith.constant 1.000000e+00 : f32
    %20 = arith.addf %cst_14, %19 : f32
    %21 = vector.broadcast %20 : f32 to vector<128x128xf32>
    %22 = arith.mulf %21, %17 : vector<128x128xf32>
    %23 = arith.addf %22, %18 : vector<128x128xf32>
    %c1_15 = arith.constant 1 : index
    %c0_16 = arith.constant 0 : index
    %c0_17 = arith.constant 0 : index
    %24 = vector.load %arg4[%c1_15, %c0_16, %c0_17] : memref<3x128x128xf32, #tpu.memory_space<vmem>>, vector<1x128x128xf32>
    %25 = vector.shape_cast %24 : vector<1x128x128xf32> to vector<128x128xf32>
    %cst_18 = arith.constant dense<0.000000e+00> : vector<128x128xf32>
    %26 = tpu.matmul %23, %25, %cst_18 {dimension_numbers = #tpu.dot_dimension_numbers<[1], [0], [0], [1], [0, 0, 1, 1], [], []>} : vector<128x128xf32>, vector<128x128xf32>, vector<128x128xf32> -> vector<128x128xf32>
    %c1_19 = arith.constant 1 : index
    %c0_20 = arith.constant 0 : index
    %c0_21 = arith.constant 0 : index
    %27 = vector.load %arg5[%c1_19, %c0_20, %c0_21] : memref<3x1x128xf32, #tpu.memory_space<vmem>>, vector<1x1x128xf32>
    %28 = vector.shape_cast %27 : vector<1x1x128xf32> to vector<1x128xf32>
    %29 = vector.broadcast %28 : vector<1x128xf32> to vector<128x128xf32>
    %30 = arith.addf %26, %29 : vector<128x128xf32>
    %cst_22 = arith.constant 0.000000e+00 : f32
    %31 = vector.broadcast %cst_22 : f32 to vector<128x128xf32>
    %32 = arith.maximumf %30, %31 : vector<128x128xf32>
    %cst_23 = arith.constant dense<0.000000e+00> : vector<128x128xf32>
    %33 = tpu.matmul %1, %32, %cst_23 {dimension_numbers = #tpu.dot_dimension_numbers<[1], [0], [0], [1], [0, 0, 1, 1], [], []>} : vector<128x128xf32>, vector<128x128xf32>, vector<128x128xf32> -> vector<128x128xf32>
    %c2 = arith.constant 2 : index
    %34 = memref.load %arg0[%c2] : memref<3xf32, #tpu.memory_space<smem>>
    %cst_24 = arith.constant 1.000000e+00 : f32
    %35 = arith.addf %cst_24, %34 : f32
    %36 = vector.broadcast %35 : f32 to vector<128x128xf32>
    %37 = arith.mulf %36, %32 : vector<128x128xf32>
    %38 = arith.addf %37, %33 : vector<128x128xf32>
    %c2_25 = arith.constant 2 : index
    %c0_26 = arith.constant 0 : index
    %c0_27 = arith.constant 0 : index
    %39 = vector.load %arg4[%c2_25, %c0_26, %c0_27] : memref<3x128x128xf32, #tpu.memory_space<vmem>>, vector<1x128x128xf32>
    %40 = vector.shape_cast %39 : vector<1x128x128xf32> to vector<128x128xf32>
    %cst_28 = arith.constant dense<0.000000e+00> : vector<128x128xf32>
    %41 = tpu.matmul %38, %40, %cst_28 {dimension_numbers = #tpu.dot_dimension_numbers<[1], [0], [0], [1], [0, 0, 1, 1], [], []>} : vector<128x128xf32>, vector<128x128xf32>, vector<128x128xf32> -> vector<128x128xf32>
    %c2_29 = arith.constant 2 : index
    %c0_30 = arith.constant 0 : index
    %c0_31 = arith.constant 0 : index
    %42 = vector.load %arg5[%c2_29, %c0_30, %c0_31] : memref<3x1x128xf32, #tpu.memory_space<vmem>>, vector<1x1x128xf32>
    %43 = vector.shape_cast %42 : vector<1x1x128xf32> to vector<1x128xf32>
    %44 = vector.broadcast %43 : vector<1x128xf32> to vector<128x128xf32>
    %45 = arith.addf %41, %44 : vector<128x128xf32>
    %c0_32 = arith.constant 0 : index
    %c0_33 = arith.constant 0 : index
    %46 = vector.load %arg2[%c0_32, %c0_33] : memref<8x128xbf16, #tpu.memory_space<vmem>>, vector<8x128xbf16>
    %47 = arith.extf %46 : vector<8x128xbf16> to vector<8x128xf32>
    %cst_34 = arith.constant dense<0.000000e+00> : vector<8x128xf32>
    %48 = tpu.matmul %47, %45, %cst_34 {dimension_numbers = #tpu.dot_dimension_numbers<[1], [0], [0], [1], [0, 0, 1, 1], [], []>} : vector<8x128xf32>, vector<128x128xf32>, vector<8x128xf32> -> vector<8x128xf32>
    %c0_35 = arith.constant 0 : index
    %c0_36 = arith.constant 0 : index
    %49 = vector.load %arg6[%c0_35, %c0_36] : memref<8x128xf32, #tpu.memory_space<vmem>>, vector<8x128xf32>
    tpu.vector_store %arg6[%c0_35, %c0_36], %48 {strides = array<i32>} : memref<8x128xf32, #tpu.memory_space<vmem>>, vector<8x128xf32>,
    return
  }
}

</mosaic_0001>

<bundles_post_ra>
// kernel: tpu_custom_call.1
= control target key start
LH: loop header
LB: loop body
LE: loop exit
PB: predicated region body
PF: predicated region fallthrough
CT: control target
= control target key end

     0   :  { %11 = vsyncpa [#allocation5], 0  ;;  %s2787_s0 = inlined_call_operand.hbm [shape: f32[3], index: 0, kind: input, shape index: {}]   ;;  %s2788_s1 = inlined_call_operand.hbm [shape: bf16[128,128], index: 1, kind: input, shape index: {}]   ;;  %s2789_s2 = inlined_call_operand.vmem [shape: bf16[8,128], index: 2, kind: input, shape index: {}]   ;;  %s2790_s3 = inlined_call_operand.hbm [shape: f32[128,128], index: 3, kind: input, shape index: {}]   ;;  %s2791_s4 = inlined_call_operand.hbm [shape: f32[3,128,128], index: 4, kind: input, shape index: {}]   ;;  %s2792_s5 = inlined_call_operand.vmem [shape: f32[3,1,128], index: 5, kind: input, shape index: {}]   ;;  %s2793_s6 = inlined_call_operand.hbm [shape: f32[8,128], index: 6, kind: output, shape index: {}]  }
   0x1   :  { %12 = vsyncpa [#allocation3], 0 }
   0x2   :  { %13 = vsyncpa [#allocation8], 0 }
   0x3   :  { %14 = vsyncpa [#allocation4], 0  ;;  %s2254_s21 = smov [#allocation7]   ;;  %s2148_s25 = scalar_lea.hbm %s2790_s3, 2048 }
   0x4   :  { %s42_s22 = sshll.u32 %s2254_s21, 4  ;;  %p2149_p0 = scmp.ne.s32.totalorder %s2790_s3, %s2148_s25  ;;  %s43_s22 = int_to_ptr.vmem [resolvable:$true] %s42_s22 }
   0x5   :  { %p2152_p1 = scmp.lt.u32.totalorder %s2148_s25, %s2790_s3 }
   0x7   :  { %p2154_p2 = pnand %p2152_p1, %p2149_p0 }
   0x9   :  { %2157 = shalt.err (!%p2154_p2)
}
   0xa   :  { %s2158_s30 = scalar_lea.vmem %s43_s22, 2048  ;;  %p2163_p4 = scmp.lt.s32.totalorder %s43_s22, %s43_s22 }
   0xb   :  { %p2159_p3 = scmp.ne.s32.totalorder %s43_s22, %s2158_s30  ;;  %p2164_p5 = scmp.lt.s32.totalorder %s2158_s30, %s2158_s30 }
   0xd   :  { %p2165_p6 = por %p2164_p5, %p2163_p4 }
   0xf   :  { %p2166_p7 = pnand %p2165_p6, %p2159_p3 }
  0x11   :  { %2169 = shalt.err (!%p2166_p7)
}
  0x12   :  { %s2255_s7 = smov 128   ;;  %s2256_s8 = smov 8  }
  0x13   :  { %48 = dma.hbm_to_vmem [thread:$0]  %s2790_s3, 2048, %s43_s22, [#allocation8], %s2255_s7, %s2255_s7, %s2256_s8  }
  0x14   :  { %s2170_s13 = scalar_lea.hbm %s2787_s0, 16 }
  0x15   :  { %p2171_p8 = scmp.ne.s32.totalorder %s2787_s0, %s2170_s13  ;;  %p2174_p9 = scmp.lt.u32.totalorder %s2170_s13, %s2787_s0 }
  0x17   :  { %p2176_p10 = pnand %p2174_p9, %p2171_p8 }
  0x19   :  { %2179 = shalt.err (!%p2176_p10)
}
  0x1a   :  { %s2257_s18 = smov [#allocation2]   ;;  %s2258_s3 = smov [#allocation6]  }
  0x1b   :  { %22 = dma.hbm_to_smem %s2787_s0, 16, %s2257_s18, [#allocation5]  }
  0x1c   :  { %s28_s21 = sshll.u32 %s2258_s3, 4  ;;  %s2180_s24 = scalar_lea.hbm %s2788_s1, 1024  ;;  %s29_s21 = int_to_ptr.vmem [resolvable:$true] %s28_s21 }
  0x1d   :  { %p2181_p11 = scmp.ne.s32.totalorder %s2788_s1, %s2180_s24  ;;  %p2184_p12 = scmp.lt.u32.totalorder %s2180_s24, %s2788_s1 }
  0x1f   :  { %p2186_p13 = pnand %p2184_p12, %p2181_p11 }
  0x21   :  { %2189 = shalt.err (!%p2186_p13)
}
  0x22   :  { %s2190_s29 = scalar_lea.vmem %s29_s21, 1024  ;;  %p2195_p1 = scmp.lt.s32.totalorder %s29_s21, %s29_s21 }
  0x23   :  { %p2191_p0 = scmp.ne.s32.totalorder %s29_s21, %s2190_s29  ;;  %p2196_p2 = scmp.lt.s32.totalorder %s2190_s29, %s2190_s29 }
  0x25   :  { %p2197_p3 = por %p2196_p2, %p2195_p1 }
  0x27   :  { %p2198_p4 = pnand %p2197_p3, %p2191_p0 }
  0x29   :  { %2201 = shalt.err (!%p2198_p4)
}
  0x2a   :  { %s2259_s0 = smov 64   ;;  %s2260_s30 = smov 4  }
  0x2b   :  { %34 = dma.hbm_to_vmem [thread:$0]  %s2788_s1, 1024, %s29_s21, [#allocation3], %s2259_s0, %s2259_s0, %s2260_s30  }
  0x2c   :  { %s2261_s11 = smov [#allocation9]   ;;  %s2202_s15 = scalar_lea.hbm %s2791_s4, 6144 }
  0x2d   :  { %s54_s12 = sshll.u32 %s2261_s11, 4  ;;  %p2203_p5 = scmp.ne.s32.totalorder %s2791_s4, %s2202_s15  ;;  %s55_s12 = int_to_ptr.vmem [resolvable:$true] %s54_s12 }
  0x2e   :  { %p2206_p6 = scmp.lt.u32.totalorder %s2202_s15, %s2791_s4 }
  0x30   :  { %p2208_p7 = pnand %p2206_p6, %p2203_p5 }
  0x32   :  { %2211 = shalt.err (!%p2208_p7)
}
  0x33   :  { %s2212_s20 = scalar_lea.vmem %s55_s12, 6144  ;;  %p2217_p9 = scmp.lt.s32.totalorder %s55_s12, %s55_s12 }
  0x34   :  { %p2213_p8 = scmp.ne.s32.totalorder %s55_s12, %s2212_s20  ;;  %p2218_p10 = scmp.lt.s32.totalorder %s2212_s20, %s2212_s20 }
  0x36   :  { %p2219_p11 = por %p2218_p10, %p2217_p9 }
  0x38   :  { %p2220_p12 = pnand %p2219_p11, %p2213_p8 }
  0x3a   :  { %2223 = shalt.err (!%p2220_p12)
}
  0x3b   :  { %60 = dma.hbm_to_vmem [thread:$0]  %s2791_s4, 6144, %s55_s12, [#allocation8], %s2255_s7, %s2255_s7, %s2256_s8  }
  0x3c   :  { %2246 = dma.done.wait [#allocation5], 16  }
  0x3d   :  { %2247 = vsyncadd [#allocation5], 4294967280 }
  0x3e   :  { %2248 = dma.done.wait [#allocation3], 1024  }
  0x3f   :  { %2249 = vsyncadd [#allocation3], 4294966272 }
  0x40   :  { %2250 = dma.done.wait [#allocation8], 8192  }
  0x41   :  { %2251 = vsyncadd [#allocation8], 4294959104 }
  0x42   :  { %75 = sfence }
  0x43   :  { %v2355_v0 = vld [vmem:[#allocation7] sm:$0xff]  ;;  %v2357_v1 = vld [vmem:[#allocation7 + $0x8] sm:$0xff]  ;;  %v2359_v2 = vld [vmem:[#allocation7 + $0x10] sm:$0xff]  ;;  %s269_s4 = sld [smem:[#allocation2]]  ;;  %s1295_s22 = sld [smem:[#allocation2 + $0x1]]  ;;  %vm2263_vm0 = vmmov 0  }
  0x44   :  { %v1920_v3 = vpack.c.bf16 %v2357_v1, %v2355_v0  ;;  %v2363_v4 = vld [vmem:[#allocation7 + $0x18] sm:$0xff]  ;;  %v2367_v6 = vld [vmem:[#allocation7 + $0x20] sm:$0xff]  ;;  %v2369_v7 = vld [vmem:[#allocation7 + $0x28] sm:$0xff]  ;;  %s1298_s26 = sld [smem:[#allocation2 + $0x2]]  ;;  %s2265_s30 = smov [#allocation10]  }
  0x45   :  { %v1924_v5 = vpack.c.bf16 %v2363_v4, %v2359_v2  ;;  %v1928_v8 = vpack.c.bf16 %v2369_v7, %v2367_v6  ;;  %v2373_v9 = vld [vmem:[#allocation6] sm:$0xff]   ;;  %v2375_v10 = vld [vmem:[#allocation7 + $0x30] sm:$0xff]  ;;  %v2377_v11 = vld [vmem:[#allocation7 + $0x38] sm:$0xff]  ;;  %s1283_s9 = sshll.u32 %s2265_s30, 4  ;;  %s1284_s9 = int_to_ptr.vmem [resolvable:$true] %s1283_s9 }
  0x46   :  { %1921 = vmatprep.subr.bf16.mxu0 %v1920_v3  ;;  %v2380_v12 = vunpack.c.l.bf16 %v2373_v9  ;;  %v304_v13 = vld [vmem:[#allocation9] sm:$0xff]  ;;  %v305_v14 = vld [vmem:[#allocation9 + $0x8] sm:$0xff]  ;;  %v306_v15 = vld [vmem:[#allocation9 + $0x10] sm:$0xff]  ;;  %v1932_v16 = vpack.c.bf16 %v2377_v11, %v2375_v10  ;;  %v2410_v48 = vunpack.c.h.bf16 %v2373_v9  ;;  %s2224_s10 = scalar_lea.vmem %s1284_s9, 128  ;;  %p2229_p0 = scmp.lt.s32.totalorder %s1284_s9, %s1284_s9 }
  0x47   :  { %1923 = vmatpush3.bf16.msra.mxu0 %v1920_v3  ;;  %v307_v17 = vld [vmem:[#allocation9 + $0x18] sm:$0xff]  ;;  %v2385_v18 = vld [vmem:[#allocation7 + $0x40] sm:$0xff]  ;;  %v2387_v19 = vld [vmem:[#allocation7 + $0x48] sm:$0xff]  ;;  %v1952_v20 = vpack.c.bf16 %v305_v14, %v304_v13  ;;  %p2225_p13 = scmp.ne.s32.totalorder %s1284_s9, %s2224_s10  ;;  %p2230_p1 = scmp.lt.s32.totalorder %s2224_s10, %s2224_s10 }
  0x48   :  { %1925 = vmatprep.subr.bf16.mxu0 %v1924_v5  ;;  %1581 = vmatprep.mubr.f32.mxu0 %v2380_v12  ;;  %v1956_v21 = vpack.c.bf16 %v307_v17, %v306_v15  ;;  %v308_v22 = vld [vmem:[#allocation9 + $0x20] sm:$0xff]  ;;  %v309_v23 = vld [vmem:[#allocation9 + $0x28] sm:$0xff]  ;;  %v1936_v24 = vpack.c.bf16 %v2387_v19, %v2385_v18  ;;  %v2391_v25 = vld [vmem:[#allocation7 + $0x50] sm:$0xff] }
  0x49   :  { %1953 = vmatprep.subr.bf16.mxu1 %v1952_v20  ;;  %v2393_v26 = vld [vmem:[#allocation7 + $0x58] sm:$0xff]  ;;  %v1960_v27 = vpack.c.bf16 %v309_v23, %v308_v22  ;;  %v310_v28 = vld [vmem:[#allocation9 + $0x30] sm:$0xff]  ;;  %v2397_v31 = vld [vmem:[#allocation7 + $0x60] sm:$0xff]  ;;  %s270_s7 = sadd.f32 1.0, %s269_s4  ;;  %p2231_p2 = por %p2230_p1, %p2229_p0 }
  0x4a   :  { %1955 = vmatpush3.bf16.msra.mxu1 %v1952_v20  ;;  %v311_v29 = vld [vmem:[#allocation9 + $0x38] sm:$0xff]  ;;  %v1940_v30 = vpack.c.bf16 %v2393_v26, %v2391_v25  ;;  %v2399_v32 = vld [vmem:[#allocation7 + $0x68] sm:$0xff]  ;;  %v312_v34 = vld [vmem:[#allocation9 + $0x40] sm:$0xff]  ;;  %s634_s23 = sadd.f32 1.0, %s1295_s22 }
  0x4b   :  { %1927 = vmatpush3.bf16.msra.mxu0 %v1924_v5  ;;  %1957 = vmatprep.subr.bf16.mxu1 %v1956_v21  ;;  %v1964_v33 = vpack.c.bf16 %v311_v29, %v310_v28  ;;  %v313_v35 = vld [vmem:[#allocation9 + $0x48] sm:$0xff]  ;;  %v1944_v36 = vpack.c.bf16 %v2399_v32, %v2397_v31  ;;  %v2403_v37 = vld [vmem:[#allocation7 + $0x70] sm:$0xff]  ;;  %v2405_v38 = vld [vmem:[#allocation7 + $0x78] sm:$0xff]  ;;  %v271_v17 = vstv %s270_s7  ;;  %s1000_s27 = sadd.f32 1.0, %s1298_s26  ;;  %p2232_p3 = pnand %p2231_p2, %p2225_p13 }
  0x4c   :  { %1929 = vmatprep.subr.bf16.mxu0 %v1928_v8  ;;  %v1968_v39 = vpack.c.bf16 %v313_v35, %v312_v34  ;;  %v314_v40 = vld [vmem:[#allocation9 + $0x50] sm:$0xff]  ;;  %v315_v41 = vld [vmem:[#allocation9 + $0x58] sm:$0xff]  ;;  %v1948_v42 = vpack.c.bf16 %v2405_v38, %v2403_v37  ;;  %v316_v44 = vld [vmem:[#allocation9 + $0x60] sm:$0xff]  ;;  %v272_v20 = vmul.f32 %v271_v17, %v2355_v0  ;;  %v275_v29 = vmul.f32 %v271_v17, %v2363_v4 }
  0x4d   :  { %v1972_v43 = vpack.c.bf16 %v315_v41, %v314_v40  ;;  %v317_v45 = vld [vmem:[#allocation9 + $0x68] sm:$0xff]  ;;  %v1334_v50 = vld [vmem:[#allocation6 + $0x10] sm:$0xff]   ;;  %v1335_v53 = vld [vmem:[#allocation6 + $0x18] sm:$0xff]   ;;  %v276_v35 = vmul.f32 %v271_v17, %v2367_v6  ;;  %v277_v0 = vmul.f32 %v271_v17, %v2369_v7  ;;  %v279_v4 = vmul.f32 %v271_v17, %v2377_v11 }
  0x4e   :  { %1959 = vmatpush3.bf16.msra.mxu1 %v1956_v21  ;;  %v1333_v46 = vld [vmem:[#allocation6 + $0x8] sm:$0xff]   ;;  %v1976_v47 = vpack.c.bf16 %v317_v45, %v316_v44  ;;  %v2418_v52 = vunpack.c.l.bf16 %v1334_v50  ;;  %v2421_v54 = vunpack.c.h.bf16 %v1334_v50  ;;  %v2424_v55 = vunpack.c.l.bf16 %v1335_v53  ;;  %v1336_v56 = vld [vmem:[#allocation6 + $0x20] sm:$0xff]   ;;  %v1338_v62 = vld [vmem:[#allocation6 + $0x30] sm:$0xff]  }
  0x4f   :  { %1931 = vmatpush3.bf16.msra.mxu0 %v1928_v8  ;;  %1961 = vmatprep.subr.bf16.mxu1 %v1960_v27  ;;  %v2412_v49 = vunpack.c.l.bf16 %v1333_v46  ;;  %v2415_v51 = vunpack.c.h.bf16 %v1333_v46  ;;  %v2427_v57 = vunpack.c.h.bf16 %v1335_v53  ;;  %v2430_v58 = vunpack.c.l.bf16 %v1336_v56  ;;  %v1337_v59 = vld [vmem:[#allocation6 + $0x28] sm:$0xff]   ;;  %v1339_v5 = vld [vmem:[#allocation6 + $0x38] sm:$0xff]   ;;  %v318_v14 = vld [vmem:[#allocation9 + $0x70] sm:$0xff] }
  0x50   :  { %1933 = vmatprep.subr.bf16.mxu0 %v1932_v16  ;;  %v2433_v60 = vunpack.c.h.bf16 %v1336_v56  ;;  %v2436_v61 = vunpack.c.l.bf16 %v1337_v59  ;;  %v2439_v63 = vunpack.c.h.bf16 %v1337_v59  ;;  %v2442_v3 = vunpack.c.l.bf16 %v1338_v62  ;;  %v319_v15 = vld [vmem:[#allocation9 + $0x78] sm:$0xff] }
  0x51   :  { %v2445_v8 = vunpack.c.h.bf16 %v1338_v62  ;;  %v2448_v9 = vunpack.c.l.bf16 %v1339_v5  ;;  %v2451_v13 = vunpack.c.h.bf16 %v1339_v5  ;;  %v273_v21 = vmul.f32 %v271_v17, %v2357_v1 }
  0x52   :  { %1963 = vmatpush3.bf16.msra.mxu1 %v1960_v27  ;;  %v274_v27 = vmul.f32 %v271_v17, %v2359_v2  ;;  %v278_v2 = vmul.f32 %v271_v17, %v2375_v10  ;;  %v280_v6 = vmul.f32 %v271_v17, %v2385_v18  ;;  %v281_v7 = vmul.f32 %v271_v17, %v2387_v19 }
  0x53   :  { %1935 = vmatpush3.bf16.msra.mxu0 %v1932_v16  ;;  %1965 = vmatprep.subr.bf16.mxu1 %v1964_v33  ;;  %v1980_v16 = vpack.c.bf16 %v319_v15, %v318_v14  ;;  %v282_v10 = vmul.f32 %v271_v17, %v2391_v25  ;;  %v283_v11 = vmul.f32 %v271_v17, %v2393_v26 }
  0x54   :  { %1937 = vmatprep.subr.bf16.mxu0 %v1936_v24  ;;  %v284_v18 = vmul.f32 %v271_v17, %v2397_v31  ;;  %v285_v19 = vmul.f32 %v271_v17, %v2399_v32  ;;  %v286_v25 = vmul.f32 %v271_v17, %v2403_v37  ;;  %v287_v26 = vmul.f32 %v271_v17, %v2405_v38  ;;  %v669_v31 = vld [vmem:[#allocation9 + $0x80] sm:$0xff]  ;;  %v670_v32 = vld [vmem:[#allocation9 + $0x88] sm:$0xff]  ;;  %v675_v38 = vld [vmem:[#allocation9 + $0xb0] sm:$0xff] }
  0x55   :  { %v676_v17 = vld [vmem:[#allocation9 + $0xb8] sm:$0xff] }
  0x56   :  { %1967 = vmatpush3.bf16.msra.mxu1 %v1964_v33 }
  0x57   :  { %1939 = vmatpush3.bf16.msra.mxu0 %v1936_v24  ;;  %1969 = vmatprep.subr.bf16.mxu1 %v1968_v39 }
  0x58   :  { %1941 = vmatprep.subr.bf16.mxu0 %v1940_v30 }
  0x5a   :  { %1971 = vmatpush3.bf16.msra.mxu1 %v1968_v39 }
  0x5b   :  { %1943 = vmatpush3.bf16.msra.mxu0 %v1940_v30  ;;  %1973 = vmatprep.subr.bf16.mxu1 %v1972_v43 }
  0x5c   :  { %1945 = vmatprep.subr.bf16.mxu0 %v1944_v36 }
  0x5e   :  { %1975 = vmatpush3.bf16.msra.mxu1 %v1972_v43 }
  0x5f   :  { %1947 = vmatpush3.bf16.msra.mxu0 %v1944_v36  ;;  %1977 = vmatprep.subr.bf16.mxu1 %v1976_v47 }
  0x60   :  { %1949 = vmatprep.subr.bf16.mxu0 %v1948_v42 }
  0x62   :  { %1979 = vmatpush3.bf16.msra.mxu1 %v1976_v47 }
  0x63   :  { %1951 = vmatpush3.bf16.msra.mxu0 %v1948_v42  ;;  %1981 = vmatprep.subr.bf16.mxu1 %v1980_v16 }
  0x66   :  { %1582 = vmatmul.mubr.f32.vlgmr.msra.gmra.mrb[0].mxu0 %v2410_v48  ;;  %1983 = vmatpush3.bf16.msra.mxu1 %v1980_v16 }
  0x67   :  { %1584 = vmatprep.mubr.f32.mxu0 %v2412_v49 }
  0x6a   :  { %1585 = vmatmul.mubr.f32.gmra.mrb[2].mxu0 %v2415_v51 }
  0x6b   :  { %1587 = vmatprep.mubr.f32.mxu0 %v2418_v52 }
  0x6e   :  { %1588 = vmatmul.mubr.f32.gmra.mrb[4].mxu0 %v2421_v54 }
  0x6f   :  { %1590 = vmatprep.mubr.f32.mxu0 %v2424_v55 }
  0x72   :  { %1591 = vmatmul.mubr.f32.gmra.mrb[6].mxu0 %v2427_v57 }
  0x73   :  { %1593 = vmatprep.mubr.f32.mxu0 %v2430_v58 }
  0x76   :  { %1594 = vmatmul.mubr.f32.gmra.mrb[8].mxu0 %v2433_v60 }
  0x77   :  { %1596 = vmatprep.mubr.f32.mxu0 %v2436_v61 }
  0x7a   :  { %1597 = vmatmul.mubr.f32.gmra.mrb[10].mxu0 %v2439_v63 }
  0x7b   :  { %1599 = vmatprep.mubr.f32.mxu0 %v2442_v3 }
  0x7e   :  { %1600 = vmatmul.mubr.f32.gmra.mrb[12].mxu0 %v2445_v8 }
  0x7f   :  { %1602 = vmatprep.mubr.f32.mxu0 %v2448_v9 }
  0x82   :  { %1603 = vmatmul.mubr.f32.gmra.mrb[14].mxu0 %v2451_v13 }
  0x83   :  { %1693 = vmatprep.mubr.f32.mxu0 %v2380_v12 }
 0x139   :  { %v1583_v22 = vpop.f32.mrb[0].mxu0 }
 0x13a   :  { %v190_v23 = vpop.f32.mrb[1].mxu0  ;;  %v289_v28 = vadd.f32 %v1583_v22, %v273_v21 }
 0x13b   :  { %v288_v24 = vadd.f32 %v272_v20, %v190_v23 }
 0x13d   :  { %v1586_v30 = vpop.f32.mrb[2].mxu0  ;;  %1637 = vmatprep.mubr.f32.mxu1 %v288_v24 }
 0x13e   :  { %v200_v33 = vpop.f32.mrb[3].mxu0  ;;  %1638 = vmatmul.mubr.f32.vlgmr.msra.gmra.mrb[0].mxu1 %v289_v28  ;;  %v291_v36 = vadd.f32 %v1586_v30, %v275_v29  ;;  %v2016_v28 = vpack.c.bf16 %v670_v32, %v669_v31  ;;  %v672_v29 = vld [vmem:[#allocation9 + $0x98] sm:$0xff] }
 0x13f   :  { %v290_v34 = vadd.f32 %v274_v27, %v200_v33  ;;  %v671_v27 = vld [vmem:[#allocation9 + $0x90] sm:$0xff]  ;;  %v673_v33 = vld [vmem:[#allocation9 + $0xa0] sm:$0xff] }
 0x140   :  { %v2020_v30 = vpack.c.bf16 %v672_v29, %v671_v27  ;;  %2017 = vmatprep.subr.bf16.mxu1 %v2016_v28 }
 0x141   :  { %v1589_v39 = vpop.f32.mrb[4].mxu0  ;;  %1640 = vmatprep.mubr.f32.mxu1 %v290_v34  ;;  %v674_v34 = vld [vmem:[#allocation9 + $0xa8] sm:$0xff]  ;;  %2019 = vmatpush3.bf16.msra.mxu1 %v2016_v28 }
 0x142   :  { %v210_v1 = vpop.f32.mrb[5].mxu0  ;;  %1641 = vmatmul.mubr.f32.gmra.mrb[2].mxu1 %v291_v36  ;;  %v293_v41 = vadd.f32 %v1589_v39, %v277_v0  ;;  %2021 = vmatprep.subr.bf16.mxu1 %v2020_v30  ;;  %v2024_v37 = vpack.c.bf16 %v674_v34, %v673_v33  ;;  %v677_v36 = vld [vmem:[#allocation9 + $0xc0] sm:$0xff]  ;;  %v678_v0 = vld [vmem:[#allocation9 + $0xc8] sm:$0xff] }
 0x143   :  { %v292_v40 = vadd.f32 %v276_v35, %v210_v1  ;;  %v2028_v35 = vpack.c.bf16 %v676_v17, %v675_v38  ;;  %v2032_v39 = vpack.c.bf16 %v678_v0, %v677_v36  ;;  %v679_v1 = vld [vmem:[#allocation9 + $0xd0] sm:$0xff] }
 0x145   :  { %v1592_v42 = vpop.f32.mrb[6].mxu0  ;;  %1643 = vmatprep.mubr.f32.mxu1 %v292_v40  ;;  %2023 = vmatpush3.bf16.msra.mxu1 %v2020_v30  ;;  %v680_v40 = vld [vmem:[#allocation9 + $0xd8] sm:$0xff] }
 0x146   :  { %v220_v43 = vpop.f32.mrb[7].mxu0  ;;  %1644 = vmatmul.mubr.f32.gmra.mrb[4].mxu1 %v293_v41  ;;  %v295_v45 = vadd.f32 %v1592_v42, %v279_v4  ;;  %2025 = vmatprep.subr.bf16.mxu1 %v2024_v37  ;;  %v681_v41 = vld [vmem:[#allocation9 + $0xe0] sm:$0xff]  ;;  %v682_v4 = vld [vmem:[#allocation9 + $0xe8] sm:$0xff] }
 0x147   :  { %v294_v44 = vadd.f32 %v278_v2, %v220_v43  ;;  %v2036_v2 = vpack.c.bf16 %v680_v40, %v679_v1  ;;  %v2040_v42 = vpack.c.bf16 %v682_v4, %v681_v41  ;;  %v2475_v43 = vld [vmem:[%s2792_s5] ss:$0 sm:$0xff] }
 0x149   :  { %v1595_v46 = vpop.f32.mrb[8].mxu0  ;;  %1646 = vmatprep.mubr.f32.mxu1 %v294_v44  ;;  %2027 = vmatpush3.bf16.msra.mxu1 %v2024_v37 }
 0x14a   :  { %v230_v47 = vpop.f32.mrb[9].mxu0  ;;  %1647 = vmatmul.mubr.f32.gmra.mrb[6].mxu1 %v295_v45  ;;  %v297_v53 = vadd.f32 %v1595_v46, %v281_v7  ;;  %2029 = vmatprep.subr.bf16.mxu1 %v2028_v35 }
 0x14b   :  { %v296_v50 = vadd.f32 %v280_v6, %v230_v47 }
 0x14d   :  { %v1598_v56 = vpop.f32.mrb[10].mxu0  ;;  %1649 = vmatprep.mubr.f32.mxu1 %v296_v50  ;;  %2031 = vmatpush3.bf16.msra.mxu1 %v2028_v35 }
 0x14e   :  { %v240_v59 = vpop.f32.mrb[11].mxu0  ;;  %1650 = vmatmul.mubr.f32.gmra.mrb[8].mxu1 %v297_v53  ;;  %v299_v5 = vadd.f32 %v1598_v56, %v283_v11  ;;  %2033 = vmatprep.subr.bf16.mxu1 %v2032_v39 }
 0x14f   :  { %v298_v62 = vadd.f32 %v282_v10, %v240_v59 }
 0x151   :  { %v1601_v14 = vpop.f32.mrb[12].mxu0  ;;  %1652 = vmatprep.mubr.f32.mxu1 %v298_v62  ;;  %2035 = vmatpush3.bf16.msra.mxu1 %v2032_v39 }
 0x152   :  { %v250_v15 = vpop.f32.mrb[13].mxu0  ;;  %1653 = vmatmul.mubr.f32.gmra.mrb[10].mxu1 %v299_v5  ;;  %v301_v20 = vadd.f32 %v1601_v14, %v285_v19  ;;  %2037 = vmatprep.subr.bf16.mxu1 %v2036_v2 }
 0x153   :  { %v300_v16 = vadd.f32 %v284_v18, %v250_v15 }
 0x155   :  { %v1604_v21 = vpop.f32.mrb[14].mxu0  ;;  %1655 = vmatprep.mubr.f32.mxu1 %v300_v16  ;;  %2039 = vmatpush3.bf16.msra.mxu1 %v2036_v2 }
 0x156   :  { %v260_v22 = vpop.f32.mrb[15].mxu0  ;;  %1656 = vmatmul.mubr.f32.gmra.mrb[12].mxu1 %v301_v20  ;;  %v303_v24 = vadd.f32 %v1604_v21, %v287_v26  ;;  %2041 = vmatprep.subr.bf16.mxu1 %v2040_v42 }
 0x157   :  { %v302_v23 = vadd.f32 %v286_v25, %v260_v22 }
 0x159   :  { %1658 = vmatprep.mubr.f32.mxu1 %v302_v23  ;;  %2043 = vmatpush3.bf16.msra.mxu1 %v2040_v42 }
 0x15a   :  { %1659 = vmatmul.mubr.f32.gmra.mrb[14].mxu1 %v303_v24 }
 0x211   :  { %v1639_v44 = vpop.f32.mrb[0].mxu1 }
 0x212   :  { %v2478_v6 = vadd.f32 %v1639_v44, %v2475_v43  ;;  %v393_v45 = vpop.f32.mrb[1].mxu1 }
 0x213   :  { %v2481_v7 = vadd.f32 %v2475_v43, %v393_v45 }
 0x214   :  { %v473_v46 = vmax.f32 %v2478_v6, 0.0 }
 0x215   :  { %v472_v47 = vmax.f32 %v2481_v7, 0.0  ;;  %v1642_v50 = vpop.f32.mrb[2].mxu1 }
 0x216   :  { %v2486_v10 = vadd.f32 %v1642_v50, %v2475_v43  ;;  %v403_v53 = vpop.f32.mrb[3].mxu1 }
 0x217   :  { %v1984_v11 = vpack.c.bf16 %v473_v46, %v472_v47  ;;  %v2493_v56 = vadd.f32 %v2475_v43, %v403_v53 }
 0x218   :  { %v475_v59 = vmax.f32 %v2486_v10, 0.0 }
 0x219   :  { %v474_v62 = vmax.f32 %v2493_v56, 0.0  ;;  %v1645_v18 = vpop.f32.mrb[4].mxu1  ;;  %1985 = vmatprep.subr.bf16.mxu0 %v1984_v11 }
 0x21a   :  { %v2498_v5 = vadd.f32 %v1645_v18, %v2475_v43  ;;  %v413_v19 = vpop.f32.mrb[5].mxu1  ;;  %1987 = vmatpush3.bf16.msra.mxu0 %v1984_v11 }
 0x21b   :  { %v1988_v14 = vpack.c.bf16 %v475_v59, %v474_v62  ;;  %v2505_v15 = vadd.f32 %v2475_v43, %v413_v19 }
 0x21c   :  { %v477_v16 = vmax.f32 %v2498_v5, 0.0 }
 0x21d   :  { %v476_v25 = vmax.f32 %v2505_v15, 0.0  ;;  %v1648_v20 = vpop.f32.mrb[6].mxu1  ;;  %1989 = vmatprep.subr.bf16.mxu0 %v1988_v14 }
 0x21e   :  { %v2510_v26 = vadd.f32 %v1648_v20, %v2475_v43  ;;  %v423_v21 = vpop.f32.mrb[7].mxu1  ;;  %1991 = vmatpush3.bf16.msra.mxu0 %v1988_v14 }
 0x21f   :  { %v1992_v22 = vpack.c.bf16 %v477_v16, %v476_v25  ;;  %v2517_v23 = vadd.f32 %v2475_v43, %v423_v21  ;;  %v684_v21 = vld [vmem:[#allocation9 + $0xf8] sm:$0xff] }
 0x220   :  { %v479_v24 = vmax.f32 %v2510_v26, 0.0 }
 0x221   :  { %v478_v31 = vmax.f32 %v2517_v23, 0.0  ;;  %v1651_v32 = vpop.f32.mrb[8].mxu1  ;;  %1993 = vmatprep.subr.bf16.mxu0 %v1992_v22 }
 0x222   :  { %v2522_v27 = vadd.f32 %v1651_v32, %v2475_v43  ;;  %v433_v28 = vpop.f32.mrb[9].mxu1  ;;  %1995 = vmatpush3.bf16.msra.mxu0 %v1992_v22  ;;  %v635_v32 = vstv %s634_s23 }
 0x223   :  { %v1996_v29 = vpack.c.bf16 %v479_v24, %v478_v31  ;;  %v2529_v30 = vadd.f32 %v2475_v43, %v433_v28  ;;  %v637_v28 = vmul.f32 %v635_v32, %v473_v46  ;;  %v641_v46 = vmul.f32 %v635_v32, %v477_v16 }
 0x224   :  { %v481_v33 = vmax.f32 %v2522_v27, 0.0  ;;  %v643_v56 = vmul.f32 %v635_v32, %v479_v24 }
 0x225   :  { %v480_v34 = vmax.f32 %v2529_v30, 0.0  ;;  %v1654_v37 = vpop.f32.mrb[10].mxu1  ;;  %1997 = vmatprep.subr.bf16.mxu0 %v1996_v29 }
 0x226   :  { %v2534_v38 = vadd.f32 %v1654_v37, %v2475_v43  ;;  %v443_v17 = vpop.f32.mrb[11].mxu1  ;;  %1999 = vmatpush3.bf16.msra.mxu0 %v1996_v29  ;;  %v636_v37 = vmul.f32 %v635_v32, %v472_v47  ;;  %v640_v47 = vmul.f32 %v635_v32, %v476_v25  ;;  %v645_v15 = vmul.f32 %v635_v32, %v481_v33 }
 0x227   :  { %v2000_v35 = vpack.c.bf16 %v481_v33, %v480_v34  ;;  %v2541_v36 = vadd.f32 %v2475_v43, %v443_v17 }
 0x228   :  { %v483_v0 = vmax.f32 %v2534_v38, 0.0 }
 0x229   :  { %v482_v39 = vmax.f32 %v2541_v36, 0.0  ;;  %v1657_v1 = vpop.f32.mrb[12].mxu1  ;;  %2001 = vmatprep.subr.bf16.mxu0 %v2000_v35 }
 0x22a   :  { %v2546_v40 = vadd.f32 %v1657_v1, %v2475_v43  ;;  %v453_v2 = vpop.f32.mrb[13].mxu1  ;;  %2003 = vmatpush3.bf16.msra.mxu0 %v2000_v35  ;;  %v647_v23 = vmul.f32 %v635_v32, %v483_v0 }
 0x22b   :  { %v2004_v41 = vpack.c.bf16 %v483_v0, %v482_v39  ;;  %v2553_v4 = vadd.f32 %v2475_v43, %v453_v2 }
 0x22c   :  { %v485_v42 = vmax.f32 %v2546_v40, 0.0 }
 0x22d   :  { %v484_v44 = vmax.f32 %v2553_v4, 0.0  ;;  %v1660_v45 = vpop.f32.mrb[14].mxu1  ;;  %2005 = vmatprep.subr.bf16.mxu0 %v2004_v41  ;;  %v1035_v4 = vld [vmem:[#allocation9 + $0x100] sm:$0xff] }
 0x22e   :  { %v2558_v50 = vadd.f32 %v1660_v45, %v2475_v43  ;;  %v463_v53 = vpop.f32.mrb[15].mxu1  ;;  %2007 = vmatpush3.bf16.msra.mxu0 %v2004_v41  ;;  %v638_v41 = vmul.f32 %v635_v32, %v474_v62  ;;  %v649_v30 = vmul.f32 %v635_v32, %v485_v42 }
 0x22f   :  { %v2008_v11 = vpack.c.bf16 %v485_v42, %v484_v44  ;;  %v2565_v18 = vadd.f32 %v2475_v43, %v463_v53  ;;  %v683_v43 = vld [vmem:[#allocation9 + $0xf0] sm:$0xff] }
 0x230   :  { %v487_v19 = vmax.f32 %v2558_v50, 0.0  ;;  %v2044_v22 = vpack.c.bf16 %v684_v21, %v683_v43  ;;  %v644_v21 = vmul.f32 %v635_v32, %v480_v34  ;;  %v1040_v50 = vld [vmem:[#allocation9 + $0x128] sm:$0xff] }
 0x231   :  { %v486_v14 = vmax.f32 %v2565_v18, 0.0  ;;  %2009 = vmatprep.subr.bf16.mxu0 %v2008_v11  ;;  %v1041_v18 = vld [vmem:[#allocation9 + $0x130] sm:$0xff] }
 0x232   :  { %2011 = vmatpush3.bf16.msra.mxu0 %v2008_v11  ;;  %2045 = vmatprep.subr.bf16.mxu1 %v2044_v22  ;;  %v651_v36 = vmul.f32 %v635_v32, %v487_v19 }
 0x233   :  { %v2012_v20 = vpack.c.bf16 %v487_v19, %v486_v14  ;;  %2047 = vmatpush3.bf16.msra.mxu1 %v2044_v22 }
 0x235   :  { %2013 = vmatprep.subr.bf16.mxu0 %v2012_v20 }
 0x236   :  { %2015 = vmatpush3.bf16.msra.mxu0 %v2012_v20  ;;  %v642_v20 = vmul.f32 %v635_v32, %v478_v31 }
 0x239   :  { %1694 = vmatmul.mubr.f32.vlgmr.msra.gmra.mrb[16].mxu0 %v2410_v48 }
 0x23a   :  { %1696 = vmatprep.mubr.f32.mxu0 %v2412_v49 }
 0x23d   :  { %1697 = vmatmul.mubr.f32.gmra.mrb[18].mxu0 %v2415_v51 }
 0x23e   :  { %1699 = vmatprep.mubr.f32.mxu0 %v2418_v52 }
 0x241   :  { %1700 = vmatmul.mubr.f32.gmra.mrb[20].mxu0 %v2421_v54 }
 0x242   :  { %1702 = vmatprep.mubr.f32.mxu0 %v2424_v55 }
 0x245   :  { %1703 = vmatmul.mubr.f32.gmra.mrb[22].mxu0 %v2427_v57 }
 0x246   :  { %1705 = vmatprep.mubr.f32.mxu0 %v2430_v58 }
 0x249   :  { %1706 = vmatmul.mubr.f32.gmra.mrb[24].mxu0 %v2433_v60 }
 0x24a   :  { %1708 = vmatprep.mubr.f32.mxu0 %v2436_v61 }
 0x24d   :  { %1709 = vmatmul.mubr.f32.gmra.mrb[26].mxu0 %v2439_v63 }
 0x24e   :  { %1711 = vmatprep.mubr.f32.mxu0 %v2442_v3 }
 0x251   :  { %1712 = vmatmul.mubr.f32.gmra.mrb[28].mxu0 %v2445_v8 }
 0x252   :  { %1714 = vmatprep.mubr.f32.mxu0 %v2448_v9 }
 0x255   :  { %1715 = vmatmul.mubr.f32.gmra.mrb[30].mxu0 %v2451_v13 }
 0x256   :  { %1805 = vmatprep.mubr.f32.mxu0 %v2380_v12  ;;  %v639_v12 = vmul.f32 %v635_v32, %v475_v59 }
 0x30c   :  { %v1695_v29 = vpop.f32.mrb[16].mxu0 }
 0x30d   :  { %v653_v17 = vadd.f32 %v1695_v29, %v637_v28  ;;  %v554_v35 = vpop.f32.mrb[17].mxu0  ;;  %v646_v28 = vmul.f32 %v635_v32, %v482_v39 }
 0x30e   :  { %v652_v1 = vadd.f32 %v636_v37, %v554_v35  ;;  %v648_v37 = vmul.f32 %v635_v32, %v484_v44  ;;  %v650_v35 = vmul.f32 %v635_v32, %v486_v14  ;;  %v1036_v44 = vld [vmem:[#allocation9 + $0x108] sm:$0xff]  ;;  %v1042_v14 = vld [vmem:[#allocation9 + $0x138] sm:$0xff] }
 0x30f   :  { %v2092_v32 = vpack.c.bf16 %v1042_v14, %v1041_v18 }
 0x310   :  { %v1698_v2 = vpop.f32.mrb[18].mxu0  ;;  %1749 = vmatprep.mubr.f32.mxu1 %v652_v1 }
 0x311   :  { %v655_v45 = vadd.f32 %v1698_v2, %v639_v12  ;;  %v564_v53 = vpop.f32.mrb[19].mxu0  ;;  %1750 = vmatmul.mubr.f32.vlgmr.msra.gmra.mrb[16].mxu1 %v653_v17  ;;  %v1037_v12 = vld [vmem:[#allocation9 + $0x110] sm:$0xff]  ;;  %v2080_v2 = vpack.c.bf16 %v1036_v44, %v1035_v4 }
 0x312   :  { %v654_v6 = vadd.f32 %v638_v41, %v564_v53  ;;  %v1038_v41 = vld [vmem:[#allocation9 + $0x118] sm:$0xff]  ;;  %v1039_v53 = vld [vmem:[#allocation9 + $0x120] sm:$0xff] }
 0x313   :  { %2081 = vmatprep.subr.bf16.mxu1 %v2080_v2  ;;  %v2088_v19 = vpack.c.bf16 %v1040_v50, %v1039_v53 }
 0x314   :  { %v1701_v7 = vpop.f32.mrb[20].mxu0  ;;  %1752 = vmatprep.mubr.f32.mxu1 %v654_v6  ;;  %2083 = vmatpush3.bf16.msra.mxu1 %v2080_v2  ;;  %v1043_v6 = vld [vmem:[#allocation9 + $0x140] sm:$0xff] }
 0x315   :  { %v657_v11 = vadd.f32 %v1701_v7, %v641_v46  ;;  %v574_v10 = vpop.f32.mrb[21].mxu0  ;;  %1753 = vmatmul.mubr.f32.gmra.mrb[18].mxu1 %v655_v45  ;;  %v2084_v45 = vpack.c.bf16 %v1038_v41, %v1037_v12  ;;  %v1044_v46 = vld [vmem:[#allocation9 + $0x148] sm:$0xff] }
 0x316   :  { %v656_v59 = vadd.f32 %v640_v47, %v574_v10  ;;  %v2096_v7 = vpack.c.bf16 %v1044_v46, %v1043_v6  ;;  %v1045_v47 = vld [vmem:[#allocation9 + $0x150] sm:$0xff] }
 0x317   :  { %2085 = vmatprep.subr.bf16.mxu1 %v2084_v45 }
 0x318   :  { %v1704_v62 = vpop.f32.mrb[22].mxu0  ;;  %1755 = vmatprep.mubr.f32.mxu1 %v656_v59  ;;  %2087 = vmatpush3.bf16.msra.mxu1 %v2084_v45  ;;  %v1047_v59 = vld [vmem:[#allocation9 + $0x160] sm:$0xff] }
 0x319   :  { %v659_v43 = vadd.f32 %v1704_v62, %v643_v56  ;;  %v584_v5 = vpop.f32.mrb[23].mxu0  ;;  %1756 = vmatmul.mubr.f32.gmra.mrb[20].mxu1 %v657_v11  ;;  %2089 = vmatprep.subr.bf16.mxu1 %v2088_v19  ;;  %v1046_v11 = vld [vmem:[#allocation9 + $0x158] sm:$0xff]  ;;  %v1048_v56 = vld [vmem:[#allocation9 + $0x168] sm:$0xff] }
 0x31a   :  { %v658_v16 = vadd.f32 %v642_v20, %v584_v5  ;;  %v2100_v10 = vpack.c.bf16 %v1046_v11, %v1045_v47  ;;  %v2104_v62 = vpack.c.bf16 %v1048_v56, %v1047_v59  ;;  %v2624_v20 = vld [vmem:[%s2792_s5 + $0x1] ss:$0 sm:$0xff] }
 0x31c   :  { %v1707_v25 = vpop.f32.mrb[24].mxu0  ;;  %1758 = vmatprep.mubr.f32.mxu1 %v658_v16  ;;  %2091 = vmatpush3.bf16.msra.mxu1 %v2088_v19 }
 0x31d   :  { %v661_v22 = vadd.f32 %v1707_v25, %v645_v15  ;;  %v594_v26 = vpop.f32.mrb[25].mxu0  ;;  %1759 = vmatmul.mubr.f32.gmra.mrb[22].mxu1 %v659_v43  ;;  %2093 = vmatprep.subr.bf16.mxu1 %v2092_v32 }
 0x31e   :  { %v660_v24 = vadd.f32 %v644_v21, %v594_v26 }
 0x320   :  { %v1710_v31 = vpop.f32.mrb[26].mxu0  ;;  %1761 = vmatprep.mubr.f32.mxu1 %v660_v24  ;;  %2095 = vmatpush3.bf16.msra.mxu1 %v2092_v32 }
 0x321   :  { %v663_v29 = vadd.f32 %v1710_v31, %v647_v23  ;;  %v604_v27 = vpop.f32.mrb[27].mxu0  ;;  %1762 = vmatmul.mubr.f32.gmra.mrb[24].mxu1 %v661_v22  ;;  %2097 = vmatprep.subr.bf16.mxu1 %v2096_v7 }
 0x322   :  { %v662_v33 = vadd.f32 %v646_v28, %v604_v27 }
 0x324   :  { %v1713_v34 = vpop.f32.mrb[28].mxu0  ;;  %1764 = vmatprep.mubr.f32.mxu1 %v662_v33  ;;  %2099 = vmatpush3.bf16.msra.mxu1 %v2096_v7 }
 0x325   :  { %v665_v17 = vadd.f32 %v1713_v34, %v649_v30  ;;  %v614_v38 = vpop.f32.mrb[29].mxu0  ;;  %1765 = vmatmul.mubr.f32.gmra.mrb[26].mxu1 %v663_v29  ;;  %2101 = vmatprep.subr.bf16.mxu1 %v2100_v10 }
 0x326   :  { %v664_v0 = vadd.f32 %v648_v37, %v614_v38 }
 0x328   :  { %v1716_v39 = vpop.f32.mrb[30].mxu0  ;;  %1767 = vmatprep.mubr.f32.mxu1 %v664_v0  ;;  %2103 = vmatpush3.bf16.msra.mxu1 %v2100_v10 }
 0x329   :  { %v667_v1 = vadd.f32 %v1716_v39, %v651_v36  ;;  %v624_v40 = vpop.f32.mrb[31].mxu0  ;;  %1768 = vmatmul.mubr.f32.gmra.mrb[28].mxu1 %v665_v17  ;;  %2105 = vmatprep.subr.bf16.mxu1 %v2104_v62 }
 0x32a   :  { %v666_v42 = vadd.f32 %v650_v35, %v624_v40 }
 0x32c   :  { %1770 = vmatprep.mubr.f32.mxu1 %v666_v42  ;;  %2107 = vmatpush3.bf16.msra.mxu1 %v2104_v62 }
 0x32d   :  { %1771 = vmatmul.mubr.f32.gmra.mrb[30].mxu1 %v667_v1 }
 0x3e4   :  { %v1751_v43 = vpop.f32.mrb[16].mxu1 }
 0x3e5   :  { %v2627_v5 = vadd.f32 %v1751_v43, %v2624_v20  ;;  %v759_v16 = vpop.f32.mrb[17].mxu1 }
 0x3e6   :  { %v2630_v15 = vadd.f32 %v2624_v20, %v759_v16 }
 0x3e7   :  { %v839_v25 = vmax.f32 %v2627_v5, 0.0 }
 0x3e8   :  { %v838_v21 = vmax.f32 %v2630_v15, 0.0  ;;  %v1754_v22 = vpop.f32.mrb[18].mxu1 }
 0x3e9   :  { %v2635_v26 = vadd.f32 %v1754_v22, %v2624_v20  ;;  %v769_v24 = vpop.f32.mrb[19].mxu1 }
 0x3ea   :  { %v2048_v23 = vpack.c.bf16 %v839_v25, %v838_v21  ;;  %v2642_v31 = vadd.f32 %v2624_v20, %v769_v24 }
 0x3eb   :  { %v841_v28 = vmax.f32 %v2635_v26, 0.0 }
 0x3ec   :  { %v840_v29 = vmax.f32 %v2642_v31, 0.0  ;;  %v1757_v27 = vpop.f32.mrb[20].mxu1  ;;  %2049 = vmatprep.subr.bf16.mxu0 %v2048_v23 }
 0x3ed   :  { %v2647_v33 = vadd.f32 %v1757_v27, %v2624_v20  ;;  %v779_v30 = vpop.f32.mrb[21].mxu1  ;;  %2051 = vmatpush3.bf16.msra.mxu0 %v2048_v23 }
 0x3ee   :  { %v2052_v34 = vpack.c.bf16 %v841_v28, %v840_v29  ;;  %v2654_v37 = vadd.f32 %v2624_v20, %v779_v30 }
 0x3ef   :  { %v843_v17 = vmax.f32 %v2647_v33, 0.0 }
 0x3f0   :  { %v842_v38 = vmax.f32 %v2654_v37, 0.0  ;;  %v1760_v0 = vpop.f32.mrb[22].mxu1  ;;  %2053 = vmatprep.subr.bf16.mxu0 %v2052_v34 }
 0x3f1   :  { %v2659_v36 = vadd.f32 %v1760_v0, %v2624_v20  ;;  %v789_v39 = vpop.f32.mrb[23].mxu1  ;;  %2055 = vmatpush3.bf16.msra.mxu0 %v2052_v34 }
 0x3f2   :  { %v2056_v35 = vpack.c.bf16 %v843_v17, %v842_v38  ;;  %v2666_v1 = vadd.f32 %v2624_v20, %v789_v39 }
 0x3f3   :  { %v845_v40 = vmax.f32 %v2659_v36, 0.0 }
 0x3f4   :  { %v844_v42 = vmax.f32 %v2666_v1, 0.0  ;;  %v1763_v4 = vpop.f32.mrb[24].mxu1  ;;  %2057 = vmatprep.subr.bf16.mxu0 %v2056_v35 }
 0x3f5   :  { %v2671_v44 = vadd.f32 %v1763_v4, %v2624_v20  ;;  %v799_v12 = vpop.f32.mrb[25].mxu1  ;;  %2059 = vmatpush3.bf16.msra.mxu0 %v2056_v35 }
 0x3f6   :  { %v2060_v2 = vpack.c.bf16 %v845_v40, %v844_v42  ;;  %v2678_v41 = vadd.f32 %v2624_v20, %v799_v12 }
 0x3f7   :  { %v847_v45 = vmax.f32 %v2671_v44, 0.0 }
 0x3f8   :  { %v846_v53 = vmax.f32 %v2678_v41, 0.0  ;;  %v1766_v50 = vpop.f32.mrb[26].mxu1  ;;  %2061 = vmatprep.subr.bf16.mxu0 %v2060_v2 }
 0x3f9   :  { %v2683_v19 = vadd.f32 %v1766_v50, %v2624_v20  ;;  %v809_v18 = vpop.f32.mrb[27].mxu1  ;;  %2063 = vmatpush3.bf16.msra.mxu0 %v2060_v2 }
 0x3fa   :  { %v2064_v14 = vpack.c.bf16 %v847_v45, %v846_v53  ;;  %v2690_v32 = vadd.f32 %v2624_v20, %v809_v18 }
 0x3fb   :  { %v849_v6 = vmax.f32 %v2683_v19, 0.0 }
 0x3fc   :  { %v848_v46 = vmax.f32 %v2690_v32, 0.0  ;;  %v1769_v7 = vpop.f32.mrb[28].mxu1  ;;  %2065 = vmatprep.subr.bf16.mxu0 %v2064_v14 }
 0x3fd   :  { %v2695_v47 = vadd.f32 %v1769_v7, %v2624_v20  ;;  %v819_v11 = vpop.f32.mrb[29].mxu1  ;;  %2067 = vmatpush3.bf16.msra.mxu0 %v2064_v14 }
 0x3fe   :  { %v2068_v10 = vpack.c.bf16 %v849_v6, %v848_v46  ;;  %v2702_v59 = vadd.f32 %v2624_v20, %v819_v11 }
 0x3ff   :  { %v851_v56 = vmax.f32 %v2695_v47, 0.0 }
 0x400   :  { %v850_v62 = vmax.f32 %v2702_v59, 0.0  ;;  %v1772_v43 = vpop.f32.mrb[30].mxu1  ;;  %2069 = vmatprep.subr.bf16.mxu0 %v2068_v10  ;;  %v2264_v59 = vmov 0.0  }
 0x401   :  { %v2707_v16 = vadd.f32 %v1772_v43, %v2624_v20  ;;  %v829_v22 = vpop.f32.mrb[31].mxu1  ;;  %2071 = vmatpush3.bf16.msra.mxu0 %v2068_v10  ;;  %v2262_v10 = vmov 0.0|0.0  }
 0x402   :  { %v2072_v24 = vpack.c.bf16 %v851_v56, %v850_v62  ;;  %v2714_v23 = vadd.f32 %v2624_v20, %v829_v22 }
 0x403   :  { %v853_v27 = vmax.f32 %v2707_v16, 0.0 }
 0x404   :  { %v852_v30 = vmax.f32 %v2714_v23, 0.0  ;;  %2073 = vmatprep.subr.bf16.mxu0 %v2072_v24 }
 0x405   :  { %2075 = vmatpush3.bf16.msra.mxu0 %v2072_v24 }
 0x406   :  { %v2076_v34 = vpack.c.bf16 %v853_v27, %v852_v30 }
 0x408   :  { %2077 = vmatprep.subr.bf16.mxu0 %v2076_v34 }
 0x409   :  { %2079 = vmatpush3.bf16.msra.mxu0 %v2076_v34 }
 0x40a   :  { %2112 = vmatprep.subr.bf16.mxu0 %v2262_v10 }
 0x40c   :  { %1806 = vmatmul.mubr.f32.vlgmr.msra.gmra.mrb[32].mxu0 %v2410_v48  ;;  %v1049_v48 = vld [vmem:[#allocation9 + $0x170] sm:$0xff] }
 0x40d   :  { %1808 = vmatprep.mubr.f32.mxu0 %v2412_v49  ;;  %v1050_v49 = vld [vmem:[#allocation9 + $0x178] sm:$0xff] }
 0x410   :  { %1809 = vmatmul.mubr.f32.gmra.mrb[34].mxu0 %v2415_v51  ;;  %v2108_v51 = vpack.c.bf16 %v1050_v49, %v1049_v48 }
 0x411   :  { %1811 = vmatprep.mubr.f32.mxu0 %v2418_v52  ;;  %v1001_v52 = vstv %s1000_s27 }
 0x412   :  { %2109 = vmatprep.subr.bf16.mxu1 %v2108_v51  ;;  %v1007_v5 = vmul.f32 %v1001_v52, %v843_v17  ;;  %v1009_v31 = vmul.f32 %v1001_v52, %v845_v40  ;;  %v1008_v0 = vmul.f32 %v1001_v52, %v844_v42  ;;  %v1011_v37 = vmul.f32 %v1001_v52, %v847_v45 }
 0x413   :  { %2111 = vmatpush3.bf16.msra.mxu1 %v2108_v51  ;;  %v1010_v35 = vmul.f32 %v1001_v52, %v846_v53  ;;  %v1013_v1 = vmul.f32 %v1001_v52, %v849_v6  ;;  %v1012_v12 = vmul.f32 %v1001_v52, %v848_v46  ;;  %v1015_v41 = vmul.f32 %v1001_v52, %v851_v56  ;;  %v1300_v56 = vld [vmem:[%s2792_s5 + $0x2] ss:$0 sm:$0xff] }
 0x414   :  { %1812 = vmatmul.mubr.f32.gmra.mrb[36].mxu0 %v2421_v54  ;;  %v1003_v54 = vmul.f32 %v1001_v52, %v839_v25  ;;  %v1006_v25 = vmul.f32 %v1001_v52, %v842_v38  ;;  %v1014_v50 = vmul.f32 %v1001_v52, %v850_v62  ;;  %v1017_v32 = vmul.f32 %v1001_v52, %v853_v27 }
 0x415   :  { %1814 = vmatprep.mubr.f32.mxu0 %v2424_v55  ;;  %v1016_v46 = vmul.f32 %v1001_v52, %v852_v30 }
 0x418   :  { %1815 = vmatmul.mubr.f32.gmra.mrb[38].mxu0 %v2427_v57  ;;  %v1002_v57 = vmul.f32 %v1001_v52, %v838_v21 }
 0x419   :  { %1817 = vmatprep.mubr.f32.mxu0 %v2430_v58 }
 0x41c   :  { %1818 = vmatmul.mubr.f32.gmra.mrb[40].mxu0 %v2433_v60 }
 0x41d   :  { %1820 = vmatprep.mubr.f32.mxu0 %v2436_v61 }
 0x420   :  { %1821 = vmatmul.mubr.f32.gmra.mrb[42].mxu0 %v2439_v63  ;;  %v1005_v63 = vmul.f32 %v1001_v52, %v841_v28 }
 0x421   :  { %1823 = vmatprep.mubr.f32.mxu0 %v2442_v3 }
 0x424   :  { %1824 = vmatmul.mubr.f32.gmra.mrb[44].mxu0 %v2445_v8  ;;  %v1004_v8 = vmul.f32 %v1001_v52, %v840_v29 }
 0x425   :  { %1826 = vmatprep.mubr.f32.mxu0 %v2448_v9 }
 0x428   :  { %1827 = vmatmul.mubr.f32.gmra.mrb[46].mxu0 %v2451_v13 }
 0x429   :  { %1917 = vmatprep.mubr.msk.f32.mxu0 %vm2263_vm0, %v2264_v59 }
 0x4df   :  { %v1807_v55 = vpop.f32.mrb[32].mxu0 }
 0x4e0   :  { %v1019_v58 = vadd.f32 %v1807_v55, %v1003_v54  ;;  %v920_v60 = vpop.f32.mrb[33].mxu0 }
 0x4e1   :  { %v1018_v61 = vadd.f32 %v1002_v57, %v920_v60 }
 0x4e3   :  { %v1810_v3 = vpop.f32.mrb[34].mxu0  ;;  %1861 = vmatprep.mubr.f32.mxu1 %v1018_v61 }
 0x4e4   :  { %v1021_v9 = vadd.f32 %v1810_v3, %v1005_v63  ;;  %v930_v13 = vpop.f32.mrb[35].mxu0  ;;  %1862 = vmatmul.mubr.f32.vlgmr.msra.gmra.mrb[32].mxu1 %v1019_v58 }
 0x4e5   :  { %v1020_v20 = vadd.f32 %v1004_v8, %v930_v13 }
 0x4e7   :  { %v1813_v15 = vpop.f32.mrb[36].mxu0  ;;  %1864 = vmatprep.mubr.f32.mxu1 %v1020_v20 }
 0x4e8   :  { %v1023_v21 = vadd.f32 %v1813_v15, %v1007_v5  ;;  %v940_v26 = vpop.f32.mrb[37].mxu0  ;;  %1865 = vmatmul.mubr.f32.gmra.mrb[34].mxu1 %v1021_v9 }
 0x4e9   :  { %v1022_v28 = vadd.f32 %v1006_v25, %v940_v26 }
 0x4eb   :  { %v1816_v29 = vpop.f32.mrb[38].mxu0  ;;  %1867 = vmatprep.mubr.f32.mxu1 %v1022_v28 }
 0x4ec   :  { %v1025_v39 = vadd.f32 %v1816_v29, %v1009_v31  ;;  %v950_v33 = vpop.f32.mrb[39].mxu0  ;;  %1868 = vmatmul.mubr.f32.gmra.mrb[36].mxu1 %v1023_v21 }
 0x4ed   :  { %v1024_v17 = vadd.f32 %v1008_v0, %v950_v33 }
 0x4ef   :  { %v1819_v38 = vpop.f32.mrb[40].mxu0  ;;  %1870 = vmatprep.mubr.f32.mxu1 %v1024_v17 }
 0x4f0   :  { %v1027_v4 = vadd.f32 %v1819_v38, %v1011_v37  ;;  %v960_v36 = vpop.f32.mrb[41].mxu0  ;;  %1871 = vmatmul.mubr.f32.gmra.mrb[38].mxu1 %v1025_v39 }
 0x4f1   :  { %v1026_v40 = vadd.f32 %v1010_v35, %v960_v36  ;;  %v1204_v35 = vld [vmem:[%s2789_s2] sm:$0xf] }
 0x4f2   :  { %v1205_v36 = vunpack.c.l.bf16 %v1204_v35 }
 0x4f3   :  { %v1822_v42 = vpop.f32.mrb[42].mxu0  ;;  %1873 = vmatprep.mubr.f32.mxu1 %v1026_v40 }
 0x4f4   :  { %v1029_v2 = vadd.f32 %v1822_v42, %v1013_v1  ;;  %v970_v44 = vpop.f32.mrb[43].mxu0  ;;  %1874 = vmatmul.mubr.f32.gmra.mrb[40].mxu1 %v1027_v4 }
 0x4f5   :  { %v1028_v45 = vadd.f32 %v1012_v12, %v970_v44 }
 0x4f7   :  { %v1825_v53 = vpop.f32.mrb[44].mxu0  ;;  %1876 = vmatprep.mubr.f32.mxu1 %v1028_v45 }
 0x4f8   :  { %v1031_v18 = vadd.f32 %v1825_v53, %v1015_v41  ;;  %v980_v19 = vpop.f32.mrb[45].mxu0  ;;  %1877 = vmatmul.mubr.f32.gmra.mrb[42].mxu1 %v1029_v2 }
 0x4f9   :  { %v1030_v14 = vadd.f32 %v1014_v50, %v980_v19 }
 0x4fb   :  { %v1828_v6 = vpop.f32.mrb[46].mxu0  ;;  %1879 = vmatprep.mubr.f32.mxu1 %v1030_v14 }
 0x4fc   :  { %v1033_v7 = vadd.f32 %v1828_v6, %v1017_v32  ;;  %v990_v47 = vpop.f32.mrb[47].mxu0  ;;  %1880 = vmatmul.mubr.f32.gmra.mrb[44].mxu1 %v1031_v18 }
 0x4fd   :  { %v1032_v11 = vadd.f32 %v1016_v46, %v990_v47 }
 0x4ff   :  { %1882 = vmatprep.mubr.f32.mxu1 %v1032_v11 }
 0x500   :  { %1883 = vmatmul.mubr.f32.gmra.mrb[46].mxu1 %v1033_v7 }
 0x5b7   :  { %v1863_v62 = vpop.f32.mrb[32].mxu1 }
 0x5b8   :  { %v1131_v43 = vadd.f32 %v1863_v62, %v1300_v56  ;;  %v1125_v16 = vpop.f32.mrb[33].mxu1 }
 0x5b9   :  { %v1126_v22 = vadd.f32 %v1300_v56, %v1125_v16 }
 0x5bb   :  { %v2113_v24 = vpack.c.bf16 %v1131_v43, %v1126_v22  ;;  %v1866_v23 = vpop.f32.mrb[34].mxu1 }
 0x5bc   :  { %v1141_v27 = vadd.f32 %v1866_v23, %v1300_v56  ;;  %v1135_v30 = vpop.f32.mrb[35].mxu1 }
 0x5bd   :  { %v1136_v34 = vadd.f32 %v1300_v56, %v1135_v30  ;;  %2114 = vmatpush3.bf16.msra.mxu0 %v2113_v24 }
 0x5be   :  { %2115 = vmatprep.subr.bf16.mxu0 %v2262_v10 }
 0x5bf   :  { %v2116_v48 = vpack.c.bf16 %v1141_v27, %v1136_v34  ;;  %v1869_v49 = vpop.f32.mrb[36].mxu1 }
 0x5c0   :  { %v1151_v51 = vadd.f32 %v1869_v49, %v1300_v56  ;;  %v1145_v52 = vpop.f32.mrb[37].mxu1 }
 0x5c1   :  { %v1146_v54 = vadd.f32 %v1300_v56, %v1145_v52  ;;  %2117 = vmatpush3.bf16.msra.mxu0 %v2116_v48 }
 0x5c2   :  { %2118 = vmatprep.subr.bf16.mxu0 %v2262_v10 }
 0x5c3   :  { %v2119_v55 = vpack.c.bf16 %v1151_v51, %v1146_v54  ;;  %v1872_v57 = vpop.f32.mrb[38].mxu1 }
 0x5c4   :  { %v1161_v58 = vadd.f32 %v1872_v57, %v1300_v56  ;;  %v1155_v60 = vpop.f32.mrb[39].mxu1 }
 0x5c5   :  { %v1156_v61 = vadd.f32 %v1300_v56, %v1155_v60  ;;  %2120 = vmatpush3.bf16.msra.mxu0 %v2119_v55 }
 0x5c6   :  { %2121 = vmatprep.subr.bf16.mxu0 %v2262_v10 }
 0x5c7   :  { %v2122_v63 = vpack.c.bf16 %v1161_v58, %v1156_v61  ;;  %v1875_v3 = vpop.f32.mrb[40].mxu1 }
 0x5c8   :  { %v1171_v8 = vadd.f32 %v1875_v3, %v1300_v56  ;;  %v1165_v9 = vpop.f32.mrb[41].mxu1 }
 0x5c9   :  { %v1166_v13 = vadd.f32 %v1300_v56, %v1165_v9  ;;  %2123 = vmatpush3.bf16.msra.mxu0 %v2122_v63 }
 0x5ca   :  { %2124 = vmatprep.subr.bf16.mxu0 %v2262_v10 }
 0x5cb   :  { %v2125_v20 = vpack.c.bf16 %v1171_v8, %v1166_v13  ;;  %v1878_v5 = vpop.f32.mrb[42].mxu1 }
 0x5cc   :  { %v1181_v15 = vadd.f32 %v1878_v5, %v1300_v56  ;;  %v1175_v25 = vpop.f32.mrb[43].mxu1 }
 0x5cd   :  { %v1176_v21 = vadd.f32 %v1300_v56, %v1175_v25  ;;  %2126 = vmatpush3.bf16.msra.mxu0 %v2125_v20 }
 0x5ce   :  { %2127 = vmatprep.subr.bf16.mxu0 %v2262_v10 }
 0x5cf   :  { %v2128_v26 = vpack.c.bf16 %v1181_v15, %v1176_v21  ;;  %v1881_v28 = vpop.f32.mrb[44].mxu1 }
 0x5d0   :  { %v1191_v31 = vadd.f32 %v1881_v28, %v1300_v56  ;;  %v1185_v29 = vpop.f32.mrb[45].mxu1 }
 0x5d1   :  { %v1186_v0 = vadd.f32 %v1300_v56, %v1185_v29  ;;  %2129 = vmatpush3.bf16.msra.mxu0 %v2128_v26 }
 0x5d2   :  { %2130 = vmatprep.subr.bf16.mxu0 %v2262_v10 }
 0x5d3   :  { %v2131_v39 = vpack.c.bf16 %v1191_v31, %v1186_v0  ;;  %v1884_v33 = vpop.f32.mrb[46].mxu1 }
 0x5d4   :  { %v1201_v17 = vadd.f32 %v1884_v33, %v1300_v56  ;;  %v1195_v37 = vpop.f32.mrb[47].mxu1 }
 0x5d5   :  { %v1196_v38 = vadd.f32 %v1300_v56, %v1195_v37  ;;  %2132 = vmatpush3.bf16.msra.mxu0 %v2131_v39 }
 0x5d6   :  { %2133 = vmatprep.subr.bf16.mxu0 %v2262_v10 }
 0x5d7   :  { %v2134_v4 = vpack.c.bf16 %v1201_v17, %v1196_v38 }
 0x5d9   :  { %2135 = vmatpush3.bf16.msra.mxu0 %v2134_v4 }
 0x5dc   :  { %1918 = vmatmul.mubr.f32.vlgmr.msra.gmra.mrb[48].mxu0 %v1205_v36 }
 0x6af   :  { %v1272_v40 = vpop.f32.mrb[48].mxu0 }
 0x6b0   :  { %1276 = vst [vmem:[#allocation10] sm:$0xff] %v1272_v40  ;;  %v1919_v1 = vpop.f32.mrb[49].mxu0 }
 0x6b1   :  { %2235 = shalt.err (!%p2232_p3)
}
 0x6b2   :  { %s2236_s12 = scalar_lea.hbm %s2793_s6, 128 }
 0x6b3   :  { %p2237_p4 = scmp.ne.s32.totalorder %s2793_s6, %s2236_s12  ;;  %p2240_p5 = scmp.lt.u32.totalorder %s2236_s12, %s2793_s6 }
 0x6b5   :  { %p2242_p6 = pnand %p2240_p5, %p2237_p4 }
 0x6b7   :  { %2245 = shalt.err (!%p2242_p6)
}
 0x6b8   :  { %1286 = dma.vmem_to_hbm [thread:$0]  %s1284_s9, 128, %s2793_s6, [#allocation4]  }
 0x6b9   :  { %2252 = dma.done.wait [#allocation4], 128  }
 0x6ba   :  { %2253 = vsyncadd [#allocation4], 4294967168 }
 0x6bb   :  { %1290 = vsyncpa [#allocation3], 1 }
 0x6bc   :  { %1291 = vsyncpa [#allocation8], 1 }
 0x6bd   :  { %1292 = vsyncpa [#allocation4], 1 }
 0x6be   :  { %1293 = vsyncpa [#allocation5], 1 }

</bundles_post_ra>
